<compile_context>
chip_gen: v7x
topology: tpu7x:2x2x1
jax: 0.10.0
libtpu: 0.0.40
codegen_flags: <defaults>
</compile_context>

<pallas_src>
import functools

import jax
import jax.numpy as jnp
from jax import lax
from jax.experimental import pallas as pl
from jax.experimental.pallas import tpu as pltpu


def _convdown_kernel(p_ref, w_ref, o_ref, ssum_ref, ssq_ref, *, n_pt, pt, p_true):
    # p_ref:    (K, pt)     transposed im2col patch tile (K = 9*Cin), zero-padded cols
    # w_ref:    (Cout, K)   reshaped conv weight (same dtype as p_ref), resident
    # o_ref:    (Cout, P_pad) whole-image conv output, resident across the tile axis (f32)
    # ssum_ref: (Cout, 1)   f32 running per-channel sum       (InstanceNorm mean)
    # ssq_ref:  (Cout, 1)   f32 running per-channel sum of sq (InstanceNorm var)
    t = pl.program_id(1)

    @pl.when(t == 0)
    def _init():
        ssum_ref[...] = jnp.zeros_like(ssum_ref)
        ssq_ref[...] = jnp.zeros_like(ssq_ref)

    # Conv-as-matmul on the MXU, f32 accumulation, lane dim = spatial tile.
    y = jnp.dot(w_ref[...], p_ref[...], preferred_element_type=jnp.float32)  # (Cout, pt)

    # Streamed per-tile statistics (zero-padded columns contribute exactly 0).
    ssum_ref[...] += jnp.sum(y, axis=-1, keepdims=True)
    ssq_ref[...] += jnp.sum(y * y, axis=-1, keepdims=True)

    # Store this tile into the resident output block (lane-dense, unmasked store).
    if n_pt == 1:
        o_ref[...] = y
    else:
        off = pl.multiple_of(t * pt, 128)  # pt is a multiple of 128
        o_ref[:, pl.ds(off, pt)] = y

    @pl.when(t == n_pt - 1)
    def _finalize():
        inv_p = 1.0 / float(p_true)                       # divide by the TRUE pixel count
        mean = ssum_ref[...] * inv_p                      # (Cout, 1)
        var = ssq_ref[...] * inv_p - mean * mean          # biased var = E[y^2] - mean^2
        scale = lax.rsqrt(var + 1e-5)
        z = (o_ref[...] - mean) * scale                   # InstanceNorm2d(affine=False)
        o_ref[...] = jnp.where(z > 0, z, 0.2 * z)         # LeakyReLU(0.2)


def _round_up(a, b):
    return -(-a // b) * b


def conv_down(x_nchw, weight, bias=None, stride=(2, 2), *,
              compute_dtype=jnp.bfloat16,
              tile_target_bytes=1 << 20,   # ~1 MiB of patch data per grid step
              max_tile_cols=8192):
    """ConvDown forward. x_nchw: (N, Cin, H, W); weight: (Cout, Cin, 3, 3); bias ignored
    (a per-channel bias is exactly cancelled by InstanceNorm2d(affine=False))."""
    del bias
    N, Cin, H, W = x_nchw.shape
    Cout, _, KH, KW = weight.shape
    sh, sw = stride
    pad = 1
    Ho = (H + 2 * pad - KH) // sh + 1
    Wo = (W + 2 * pad - KW) // sw + 1
    P = Ho * Wo
    K = KH * KW * Cin
    itemsize = jnp.dtype(compute_dtype).itemsize

    # --- spatial tiling: byte-targeted tile (multiple of 128); pad P so it splits
    # into n_pt equal, 128-aligned tiles (bounded waste, unmasked stores).
    P128 = _round_up(P, 128)
    pt_target = max(128, (tile_target_bytes // (K * itemsize)) // 128 * 128)
    pt_target = min(pt_target, max_tile_cols)
    n_pt = max(1, -(-P128 // pt_target))
    pt = _round_up(-(-P128 // n_pt), 128)
    P_pad = n_pt * pt

    # --- glue (layout only): cast EARLY so the im2col intermediate is built and
    # materialized in the compute dtype (bf16 by default), then pad / slice / stack.
    xp = jnp.pad(x_nchw.astype(compute_dtype), ((0, 0), (0, 0), (pad, pad), (pad, pad)))
    slabs = []
    for kh in range(KH):
        for kw in range(KW):
            slabs.append(xp[:, :, kh:kh + sh * (Ho - 1) + 1:sh,
                            kw:kw + sw * (Wo - 1) + 1:sw])            # (N, Cin, Ho, Wo)
    patches_t = jnp.stack(slabs, axis=1).reshape(N, K, P)             # k = (kh*KW+kw)*Cin + cin
    if P_pad != P:
        patches_t = jnp.pad(patches_t, ((0, 0), (0, 0), (0, P_pad - P)))

    # weight (Cout, Cin, KH, KW) -> (Cout, KH, KW, Cin) -> (Cout, K); same k ordering.
    wmat = jnp.transpose(weight, (0, 2, 3, 1)).reshape(Cout, K).astype(compute_dtype)

    # --- VMEM budget (generation dependent cap).
    vmem_needed = (2 * K * pt * itemsize          # double-buffered patch tiles
                   + 2 * Cout * K * itemsize      # weight (resident)
                   + 2 * Cout * P_pad * 4         # resident f32 output block (+writeback buf)
                   + Cout * P_pad * 4             # finalize elementwise temporary
                   + 2 * Cout * 4                 # stat scratches
                   + (2 << 20))                   # Mosaic internal scratch / headroom
    try:
        phys_vmem = int(pltpu.get_tpu_info().vmem_capacity_bytes)
    except Exception:
        phys_vmem = 64 << 20                      # conservative (v7x per-core VMEM)
    vmem_cap = (phys_vmem * 3) // 4               # ~48 MiB on v7x, ~96 MiB on v5e/v6e
    vmem_limit = int(min(max(vmem_needed, 16 << 20), vmem_cap))

    kernel = functools.partial(_convdown_kernel, n_pt=n_pt, pt=pt, p_true=P)

    cost = pl.CostEstimate(
        flops=2 * N * Cout * K * P_pad,
        transcendentals=N * Cout,
        bytes_accessed=(N * K * P_pad * itemsize + Cout * K * itemsize
                        + N * Cout * P_pad * 4),
    )

    out = pl.pallas_call(
        kernel,
        out_shape=jax.ShapeDtypeStruct((N, Cout, P_pad), jnp.float32),
        grid_spec=pltpu.PrefetchScalarGridSpec(
            num_scalar_prefetch=0,
            grid=(N, n_pt),
            in_specs=[
                pl.BlockSpec((None, K, pt), lambda n, t: (n, 0, t)),   # patches^T tile
                pl.BlockSpec((Cout, K), lambda n, t: (0, 0)),          # weight, resident
            ],
            out_specs=pl.BlockSpec((None, Cout, P_pad), lambda n, t: (n, 0, 0)),
            scratch_shapes=[pltpu.VMEM((Cout, 1), jnp.float32),        # sum
                            pltpu.VMEM((Cout, 1), jnp.float32)],       # sum of squares
        ),
        compiler_params=pltpu.CompilerParams(
            dimension_semantics=("parallel", "arbitrary"),
            vmem_limit_bytes=vmem_limit,
        ),
        cost_estimate=cost,
    )(patches_t, wmat)

    # (N, Cout, P_pad) -> crop zero-padded columns -> (N, Cout, Ho, Wo); reshape only.
    return out[:, :, :P].reshape(N, Cout, Ho, Wo)


def _reference(x_nchw, weight, bias, stride=(2, 2)):
    """Pure-JAX reference matching PyTorch semantics (with bias, f32 everywhere)."""
    y = lax.conv_general_dilated(
        x_nchw.astype(jnp.float32), weight.astype(jnp.float32),
        window_strides=stride, padding=((1, 1), (1, 1)),
        dimension_numbers=("NCHW", "OIHW", "NCHW"))
    y = y + bias.reshape(1, -1, 1, 1)
    mean = jnp.mean(y, axis=(2, 3), keepdims=True)
    var = jnp.mean(jnp.square(y - mean), axis=(2, 3), keepdims=True)
    y = (y - mean) * lax.rsqrt(var + 1e-5)
    return jnp.where(y > 0, y, 0.2 * y)


if __name__ == "__main__":
    key = jax.random.PRNGKey(0)
    kx, kw, kb, kx2, kw2, kb2 = jax.random.split(key, 6)

    # --- primary test: small shapes implied by the module (single spatial tile) ---
    N, Cin, H, W, Cout = 2, 4, 16, 16, 8
    fan_in = Cin * 3 * 3
    bound = 1.0 / (fan_in ** 0.5)
    x = jax.random.normal(kx, (N, Cin, H, W), dtype=jnp.float32)
    weight = jax.random.uniform(kw, (Cout, Cin, 3, 3), jnp.float32, -bound, bound)
    bias = jax.random.uniform(kb, (Cout,), jnp.float32, -bound, bound)

    ref = _reference(x, weight, bias)

    # Exact-math path (f32 matmul operands): tight tolerance.
    out_f32 = jax.block_until_ready(conv_down(x, weight, bias, compute_dtype=jnp.float32))
    assert out_f32.shape == (N, Cout, H // 2, W // 2), out_f32.shape
    assert jnp.allclose(out_f32, ref, rtol=1e-4, atol=1e-4), "f32 path mismatch vs reference"

    # Default bf16-operand path (f32 accumulation + f32 norm math): looser tolerance.
    out_bf16 = jax.block_until_ready(conv_down(x, weight, bias))
    assert out_bf16.shape == (N, Cout, H // 2, W // 2), out_bf16.shape
    assert jnp.allclose(out_bf16, ref, rtol=2e-2, atol=2e-2), "bf16 path mismatch vs reference"

    # --- secondary test: odd spatial size -> exercises P zero-padding, multi-tile
    # spatial axis, and the streamed sum/sumsq accumulators (tiny tile target forces
    # n_pt > 1 even at this small size).
    N2, Cin2, H2, W2, Cout2 = 1, 8, 30, 30, 16
    bound2 = 1.0 / ((Cin2 * 9) ** 0.5)
    x2 = jax.random.normal(kx2, (N2, Cin2, H2, W2), dtype=jnp.float32)
    w2 = jax.random.uniform(kw2, (Cout2, Cin2, 3, 3), jnp.float32, -bound2, bound2)
    b2 = jax.random.uniform(kb2, (Cout2,), jnp.float32, -bound2, bound2)
    ref2 = _reference(x2, w2, b2)
    out2 = jax.block_until_ready(
        conv_down(x2, w2, b2, compute_dtype=jnp.float32, tile_target_bytes=1024))
    assert out2.shape == (N2, Cout2, 15, 15), out2.shape
    assert jnp.allclose(out2, ref2, rtol=1e-4, atol=1e-4), "tiled/padded path mismatch vs reference"

    print("KERNEL_OK")
</pallas_src>

<mosaic_0001>
module attributes {stable_mosaic.version = 11 : i64} {
  func.func @_convdown_kernel(%arg0: i32, %arg1: i32, %arg2: memref<1x36x128xf32, #tpu.memory_space<vmem>>, %arg3: memref<8x36xf32, #tpu.memory_space<vmem>>, %arg4: memref<1x8x128xf32, #tpu.memory_space<vmem>>, %arg5: memref<8x1xf32, #tpu.memory_space<vmem>>, %arg6: memref<8x1xf32, #tpu.memory_space<vmem>>) attributes {dimension_semantics = [#tpu.dimension_semantics<parallel>, #tpu.dimension_semantics<arbitrary>], iteration_bounds = array<i64: 2, 1>, scalar_prefetch = 0 : i64, scratch_operands = 2 : i64, tpu.core_type = #tpu.core_type<tc>, window_params = [{transform_indices = @transform_0, window_bounds = array<i64: 1, 36, 128>}, {pipeline_mode = #tpu.pipeline_mode<synchronous>, transform_indices = @transform_1, window_bounds = array<i64: 8, 36>}, {transform_indices = @transform_2, window_bounds = array<i64: 1, 8, 128>}]} {
    %c0_i32 = arith.constant 0 : i32
    %0 = arith.cmpi eq, %arg1, %c0_i32 : i32
    %1 = arith.extui %0 : i1 to i32
    %c0_i32_0 = arith.constant 0 : i32
    %2 = arith.cmpi ne, %1, %c0_i32_0 : i32
    scf.if %2 {
      %cst_20 = arith.constant 0.000000e+00 : f32
      %24 = vector.broadcast %cst_20 : f32 to vector<8x1xf32>
      %c0_21 = arith.constant 0 : index
      %c0_22 = arith.constant 0 : index
      %25 = vector.load %arg5[%c0_21, %c0_22] : memref<8x1xf32, #tpu.memory_space<vmem>>, vector<8x1xf32>
      tpu.vector_store %arg5[%c0_21, %c0_22], %24 {strides = array<i32>} : memref<8x1xf32, #tpu.memory_space<vmem>>, vector<8x1xf32>,
      %cst_23 = arith.constant 0.000000e+00 : f32
      %26 = vector.broadcast %cst_23 : f32 to vector<8x1xf32>
      %c0_24 = arith.constant 0 : index
      %c0_25 = arith.constant 0 : index
      %27 = vector.load %arg6[%c0_24, %c0_25] : memref<8x1xf32, #tpu.memory_space<vmem>>, vector<8x1xf32>
      tpu.vector_store %arg6[%c0_24, %c0_25], %26 {strides = array<i32>} : memref<8x1xf32, #tpu.memory_space<vmem>>, vector<8x1xf32>,
    } else {
    }
    %c0 = arith.constant 0 : index
    %c0_1 = arith.constant 0 : index
    %3 = vector.load %arg3[%c0, %c0_1] : memref<8x36xf32, #tpu.memory_space<vmem>>, vector<8x36xf32>
    %c0_2 = arith.constant 0 : index
    %c0_3 = arith.constant 0 : index
    %c0_4 = arith.constant 0 : index
    %4 = vector.load %arg2[%c0_2, %c0_3, %c0_4] : memref<1x36x128xf32, #tpu.memory_space<vmem>>, vector<1x36x128xf32>
    %5 = vector.shape_cast %4 : vector<1x36x128xf32> to vector<36x128xf32>
    %cst = arith.constant dense<0.000000e+00> : vector<8x128xf32>
    %6 = tpu.matmul %3, %5, %cst {dimension_numbers = #tpu.dot_dimension_numbers<[1], [0], [0], [1], [0, 0, 1, 1], [], []>} : vector<8x36xf32>, vector<36x128xf32>, vector<8x128xf32> -> vector<8x128xf32>
    %c0_5 = arith.constant 0 : index
    %c0_6 = arith.constant 0 : index
    %7 = vector.load %arg5[%c0_5, %c0_6] : memref<8x1xf32, #tpu.memory_space<vmem>>, vector<8x1xf32>
    %cst_7 = arith.constant dense<0.000000e+00> : vector<8xf32>
    %8 = vector.multi_reduction <add>, %6, %cst_7 [1] : vector<8x128xf32> to vector<8xf32>
    %9 = vector.shape_cast %8 : vector<8xf32> to vector<8x1xf32>
    %10 = arith.addf %7, %9 : vector<8x1xf32>
    %c0_8 = arith.constant 0 : index
    %c0_9 = arith.constant 0 : index
    %11 = vector.load %arg5[%c0_8, %c0_9] : memref<8x1xf32, #tpu.memory_space<vmem>>, vector<8x1xf32>
    tpu.vector_store %arg5[%c0_8, %c0_9], %10 {strides = array<i32>} : memref<8x1xf32, #tpu.memory_space<vmem>>, vector<8x1xf32>,
    %c0_10 = arith.constant 0 : index
    %c0_11 = arith.constant 0 : index
    %12 = vector.load %arg6[%c0_10, %c0_11] : memref<8x1xf32, #tpu.memory_space<vmem>>, vector<8x1xf32>
    %13 = arith.mulf %6, %6 : vector<8x128xf32>
    %cst_12 = arith.constant dense<0.000000e+00> : vector<8xf32>
    %14 = vector.multi_reduction <add>, %13, %cst_12 [1] : vector<8x128xf32> to vector<8xf32>
    %15 = vector.shape_cast %14 : vector<8xf32> to vector<8x1xf32>
    %16 = arith.addf %12, %15 : vector<8x1xf32>
    %c0_13 = arith.constant 0 : index
    %c0_14 = arith.constant 0 : index
    %17 = vector.load %arg6[%c0_13, %c0_14] : memref<8x1xf32, #tpu.memory_space<vmem>>, vector<8x1xf32>
    tpu.vector_store %arg6[%c0_13, %c0_14], %16 {strides = array<i32>} : memref<8x1xf32, #tpu.memory_space<vmem>>, vector<8x1xf32>,
    %c0_15 = arith.constant 0 : index
    %c0_16 = arith.constant 0 : index
    %c0_17 = arith.constant 0 : index
    %18 = vector.load %arg4[%c0_15, %c0_16, %c0_17] : memref<1x8x128xf32, #tpu.memory_space<vmem>>, vector<1x8x128xf32>
    %19 = vector.shape_cast %18 : vector<1x8x128xf32> to vector<8x128xf32>
    %20 = vector.shape_cast %6 : vector<8x128xf32> to vector<1x8x128xf32>
    tpu.vector_store %arg4[%c0_15, %c0_16, %c0_17], %20 {strides = array<i32>} : memref<1x8x128xf32, #tpu.memory_space<vmem>>, vector<1x8x128xf32>,
    %c0_i32_18 = arith.constant 0 : i32
    %21 = arith.cmpi eq, %arg1, %c0_i32_18 : i32
    %22 = arith.extui %21 : i1 to i32
    %c0_i32_19 = arith.constant 0 : i32
    %23 = arith.cmpi ne, %22, %c0_i32_19 : i32
    scf.if %23 {
      %c0_20 = arith.constant 0 : index
      %c0_21 = arith.constant 0 : index
      %24 = vector.load %arg5[%c0_20, %c0_21] : memref<8x1xf32, #tpu.memory_space<vmem>>, vector<8x1xf32>
      %cst_22 = arith.constant 1.562500e-02 : f32
      %25 = vector.broadcast %cst_22 : f32 to vector<8x1xf32>
      %26 = arith.mulf %24, %25 : vector<8x1xf32>
      %c0_23 = arith.constant 0 : index
      %c0_24 = arith.constant 0 : index
      %27 = vector.load %arg6[%c0_23, %c0_24] : memref<8x1xf32, #tpu.memory_space<vmem>>, vector<8x1xf32>
      %cst_25 = arith.constant 1.562500e-02 : f32
      %28 = vector.broadcast %cst_25 : f32 to vector<8x1xf32>
      %29 = arith.mulf %27, %28 : vector<8x1xf32>
      %30 = arith.mulf %26, %26 : vector<8x1xf32>
      %31 = arith.subf %29, %30 : vector<8x1xf32>
      %cst_26 = arith.constant 9.99999974E-6 : f32
      %32 = vector.broadcast %cst_26 : f32 to vector<8x1xf32>
      %33 = arith.addf %31, %32 : vector<8x1xf32>
      %34 = math.rsqrt %33 : vector<8x1xf32>
      %c0_27 = arith.constant 0 : index
      %c0_28 = arith.constant 0 : index
      %c0_29 = arith.constant 0 : index
      %35 = vector.load %arg4[%c0_27, %c0_28, %c0_29] : memref<1x8x128xf32, #tpu.memory_space<vmem>>, vector<1x8x128xf32>
      %36 = vector.shape_cast %35 : vector<1x8x128xf32> to vector<8x128xf32>
      %37 = vector.broadcast %26 : vector<8x1xf32> to vector<8x128xf32>
      %38 = arith.subf %36, %37 : vector<8x128xf32>
      %39 = vector.broadcast %34 : vector<8x1xf32> to vector<8x128xf32>
      %40 = arith.mulf %38, %39 : vector<8x128xf32>
      %cst_30 = arith.constant 0.000000e+00 : f32
      %41 = vector.broadcast %cst_30 : f32 to vector<8x128xf32>
      %42 = arith.cmpf ogt, %40, %41 : vector<8x128xf32>
      %cst_31 = arith.constant 2.000000e-01 : f32
      %43 = vector.broadcast %cst_31 : f32 to vector<8x128xf32>
      %44 = arith.mulf %43, %40 : vector<8x128xf32>
      %45 = arith.select %42, %40, %44 : vector<8x128xi1>, vector<8x128xf32>
      %c0_32 = arith.constant 0 : index
      %c0_33 = arith.constant 0 : index
      %c0_34 = arith.constant 0 : index
      %46 = vector.load %arg4[%c0_32, %c0_33, %c0_34] : memref<1x8x128xf32, #tpu.memory_space<vmem>>, vector<1x8x128xf32>
      %47 = vector.shape_cast %46 : vector<1x8x128xf32> to vector<8x128xf32>
      %48 = vector.shape_cast %45 : vector<8x128xf32> to vector<1x8x128xf32>
      tpu.vector_store %arg4[%c0_32, %c0_33, %c0_34], %48 {strides = array<i32>} : memref<1x8x128xf32, #tpu.memory_space<vmem>>, vector<1x8x128xf32>,
    } else {
    }
    return
  }
  func.func @transform_0(%arg0: i32, %arg1: i32) -> (i32, i32, i32) {
    %c0_i32 = arith.constant 0 : i32
    %c0_i32_0 = arith.constant 0 : i32
    return %arg0, %c0_i32, %arg1 : i32, i32, i32
  }
  func.func @transform_1(%arg0: i32, %arg1: i32) -> (i32, i32) {
    %c0_i32 = arith.constant 0 : i32
    %c0_i32_0 = arith.constant 0 : i32
    %c0_i32_1 = arith.constant 0 : i32
    return %c0_i32, %c0_i32_0 : i32, i32
  }
  func.func @transform_2(%arg0: i32, %arg1: i32) -> (i32, i32, i32) {
    %c0_i32 = arith.constant 0 : i32
    %c0_i32_0 = arith.constant 0 : i32
    %c0_i32_1 = arith.constant 0 : i32
    return %arg0, %c0_i32, %c0_i32_0 : i32, i32, i32
  }
}

</mosaic_0001>

<bundles_post_ra>
// kernel: tpu_custom_call.1
= control target key start
LH: loop header
LB: loop body
LE: loop exit
PB: predicated region body
PF: predicated region fallthrough
CT: control target
= control target key end

     0   :  { %7 = vsyncpa [#allocation5], 0  ;;  %s705_s0 = inlined_call_operand.vmem [shape: f32[2,36,128], index: 0, kind: input, shape index: {}]   ;;  %s706_s1 = inlined_call_operand.vmem [shape: f32[8,36], index: 1, kind: input, shape index: {}]   ;;  %s707_s2 = inlined_call_operand.hbm [shape: f32[2,8,128], index: 2, kind: output, shape index: {}]  }
   0x1   :  { %9 = vsyncpa [#allocation5 + $0x1], 0  ;;  %s586_s9 = smov 0   ;;  %s588_s10 = smov 0  }
   0x2   :  { %s590_s11 = smov 0   ;;  %s592_s12 = smov 0  }
   0x3   :  { %s594_s13 = smov 0   ;;  %s596_s14 = smov 0  }
   0x4 LB: > { %s384_s15 = sadd.s32 4294967295, %s564_s14   ;;  %s385_s16 = sadd.s32 4294967294, %s564_s14   ;;  %s564_s14 = sphi %s596_s14, %s15_s14   ;;  %s560_s13 = sphi %s594_s13, %s714_s13   ;;  %s556_s12 = sphi %s592_s12, %s713_s12   ;;  %s552_s11 = sphi %s590_s11, %s712_s11   ;;  %s548_s10 = sphi %s588_s10, %s711_s10   ;;  %s544_s9 = sphi %s586_s9, %s710_s9  }
   0x5   : > { %s27_s17 = sadd.s32 1, %s560_s13  ;;  %s83_s18 = sadd.s32 1, %s552_s11 }
   0x6   : > { %p29_p0 = scmp.ge.s32.totalorder %s27_s17, 2  ;;  %p93_p1 = scmp.ne.s32.totalorder %s552_s11, %s548_s10 }
   0x7   : > { %p94_p2 = scmp.eq.s32.totalorder %s384_s15, 1  ;;  %p99_p3 = scmp.ne.s32.totalorder %s548_s10, %s544_s9 }
   0x8   : > { %s716_s17 = smov (%p29_p0, %s27_s17), 0  ;;  %p100_p5 = scmp.eq.s32.totalorder %s385_s16, 1 }
   0x9   : > { %p626_p4 = por %p94_p2, %p93_p1  ;;  %s80_s20 = ssub.s32 %s560_s13, %s716_s17 }
   0xa   : > { %p388_p6 = scmp.ge.s32.totalorder %s564_s14, 1  ;;  %p81_p7 = scmp.eq.s32.totalorder %s80_s20, 0 }
   0xb   : > { %p633_p8 = por %p100_p5, %p99_p3  ;;  %p132_p9 = scmp.lt.s32.totalorder %s564_s14, 3 }
   0xc   : > { %s639_s22 = scalar_select %p81_p7, %s552_s11, %s83_s18  }
   0xd   : > { %p133_p10 = pnand %p388_p6, %p132_p9 }
   0xe   : > { %p157_p11 = scmp.lt.s32.totalorder (!%p133_p10), %s556_s12, 1  ;;  %vm169_vm0 = vcmask (!%p133_p10), 7168   ;;  %v566_v0 = vmov (!%p133_p10), 0.0|0.0   ;;  %v567_v1 = vmov (!%p133_p10), 0.0   ;;  %vm568_vm1 = vmmov (!%p133_p10), 0   ;;  %v172_v9 = vld [vmem:[%s706_s1] sm:$0xff] (!%p133_p10) }
   0xf   : > { %136 = sbr.rel (%p133_p10) target bundleno = 571 (0x23b), region = 28  ;;  %416 = vmatprep.subr.bf16.mxu0 (!%p133_p10), %v566_v0  ;;  %170 = vst.msk [vmem:[#allocation2] sm:$0xff] (!%p133_p10), %vm169_vm0, %v567_v1  ;;  %171 = vst.msk [vmem:[#allocation3] sm:$0xff] (!%p133_p10), %vm169_vm0, %v567_v1  ;;  %413 = vmatprep.mubr.msk.f32.mxu0 (!%p133_p10), %vm568_vm1, %v567_v1  ;;  %vm182_vm2 = vcmask (!%p133_p10), 1043456   ;;  %vm178_vm3 = vcmask (!%p133_p10), 293888   ;;  %v569_v13 = vmov (!%p133_p10), 0  }
  0x10   : > { %482 = vset.pattern.permute.xlu1 (!%p133_p10), %v569_v13  ;;  %483 = vset.pattern.permute.xlu0 (!%p133_p10), %v569_v13  ;;  %s154_s30 = sand.u32 (!%p133_p10), 1, %s548_s10   ;;  %s394_s4 = sshll.u32 (!%p133_p10), %s556_s12, 7 }
  0x11   : > { %s389_s3 = sshll.u32 (!%p133_p10), %s154_s30, 3  ;;  %s658_s15 = scalar_lea.hbm (!%p133_p10), %s707_s2, %s394_s4 }
  0x12   : > { %s156_s5 = scalar_lea.vmem (!%p133_p10), [#allocation4], %s389_s3  ;;  %s298_s16 = scalar_lea.sflag (!%p133_p10), [#allocation5], %s154_s30 }
  0x13   : > { %s311_s6 = sshll.u32 (!%p133_p10), %s156_s5, 4  ;;  %s660_s6 = int_to_ptr.vmem [resolvable:$true] %s311_s6 }
  0x14   : > { %s486_s18 = scalar_lea.vmem (!%p133_p10), %s660_s6, 128 }
  0x15   : > { %p487_p12 = scmp.ne.s32.totalorder (!%p133_p10), %s660_s6, %s486_s18 }
  0x16   : > { %s158_s23 = scalar_select %p157_p11, %s556_s12, 1  ;;  %v256_v14 = vld [vmem:[#allocation2] sm:$0xff]  ;;  %v262_v17 = vld [vmem:[#allocation3] sm:$0xff] }
  0x17   : > { %p488_p13 = pnand %p487_p12, %p626_p4  ;;  %s570_s12 = smov [#allocation4]  }
  0x18   : > { %s422_s24 = smul.u32 40, %s158_s23  ;;  %s490_s20 = sshll.u32 %s570_s12, 4  ;;  %s491_s20 = int_to_ptr.vmem [resolvable:$false] %s490_s20 }
  0x19   : > { %p489_p0 = pneg %p488_p13  ;;  %s492_s23 = scalar_lea.vmem %s491_s20, 256 }
  0x1a   : > { %s164_s27 = scalar_lea.vmem %s705_s0, %s422_s24  ;;  %p493_p1 = scmp.lt.s32.totalorder %s660_s6, %s491_s20 }
  0x1b   : > { %v173_v2 = vld [vmem:[%s164_s27] sm:$0xff]  ;;  %v174_v3 = vld [vmem:[%s164_s27 + $0x8] sm:$0xff]  ;;  %v175_v4 = vld [vmem:[%s164_s27 + $0x10] sm:$0xff]  ;;  %p494_p2 = scmp.lt.s32.totalorder %s492_s23, %s486_s18 }
  0x1c   : > { %v417_v5 = vpack.c.bf16 %v174_v3, %v173_v2  ;;  %v176_v6 = vld [vmem:[%s164_s27 + $0x18] sm:$0xff]  ;;  %v177_v8 = vld [vmem:[%s164_s27 + $0x20] sm:$0xf] }
  0x1d   : > { %v420_v7 = vpack.c.bf16 %v176_v6, %v175_v4  ;;  %p495_p3 = por %p494_p2, %p493_p1 }
  0x1e   : > { %418 = vmatpush3.bf16.msra.mxu0 %v417_v5 }
  0x1f   : > { %419 = vmatprep.subr.bf16.mxu0 %v566_v0  ;;  %p496_p5 = pnand %p495_p3, %p489_p0 }
  0x22   : > { %421 = vmatpush3.bf16.msra.mxu0 %v420_v7 }
  0x23   : > { %411 = vmatprep.subr.mxu0 %v567_v1 }
  0x26   : > { %412 = vmatpush3.msk.msra.mxu0 %vm182_vm2, %v177_v8 }
  0x27   : > { %414 = vmatmul.mubr.msk.f32.vlgmr.msra.gmra.mrb[0].mxu0 %vm178_vm3, %v172_v9 }
  0xfa   : > { %v252_v10 = vpop.f32.mrb[0].mxu0 }
  0xfb   : > { %257 = vadd.xlane.f32.xlu0 %v252_v10  ;;  %v415_v11 = vpop.f32.mrb[1].mxu0  ;;  %v263_v12 = vmul.f32 %v252_v10, %v252_v10 }
  0xff   : > { %264 = vadd.xlane.f32.xlu0 %v263_v12 }
 0x188   : > { %v258_v15 = vpop.xlane.xlu0 %257 }
 0x189   : > { %v259_v16 = vadd.f32 %v258_v15, %v256_v14 }
 0x18b   : > { %261 = vst.msk [vmem:[#allocation2] sm:$0xff] %vm169_vm0, %v259_v16 }
 0x18c   : > { %v265_v18 = vpop.xlane.xlu0 %264 }
 0x18d   : > { %v266_v19 = vadd.f32 %v265_v18, %v262_v17 }
 0x18f   : > { %267 = vst.msk [vmem:[#allocation3] sm:$0xff] %vm169_vm0, %v266_v19 }
 0x192   : > { %v272_v20 = vld [vmem:[#allocation2] sm:$0xff] }
 0x193   : > { %v273_v21 = vmul.f32 0.015625, %v272_v20 }
 0x195   : > { %283 = vperm.xlu1 %482, %v273_v21   ;;  %v276_v24 = vmul.f32 %v273_v21, %v273_v21 }
 0x196   : > { %v274_v22 = vld [vmem:[#allocation3] sm:$0xff] }
 0x197   : > { %v275_v23 = vmul.f32 0.015625, %v274_v22 }
 0x199   : > { %v277_v25 = vsub.f32 %v275_v23, %v276_v24 }
 0x19b   : > { %v278_v26 = vadd.f32 1e-05, %v277_v25 }
 0x19d   : > { %484 = vrsqrt.f32 %v278_v26 }
 0x1a7   : > { %v485_v27 = vpop.eup %484 }
 0x1a8   : > { %289 = vperm.xlu1 %482, %v485_v27  }
 0x214   : > { %v284_v28 = vpop.permute.xlu1 %283 }
 0x215   : > { %v286_v29 = vsub.f32 %v252_v10, %v284_v28 }
 0x227   : > { %v290_v30 = vpop.permute.xlu1 %289 }
 0x228   : > { %v292_v31 = vmul.f32 %v290_v30, %v286_v29 }
 0x22a   : > { %vm293_vm4 = vcmp.gt.f32.partialorder %v292_v31, 0.0  ;;  %v294_v32 = vmul.f32 0.2, %v292_v31 }
 0x22c   : > { %v295_v33 = vsel %vm293_vm4, %v292_v31, %v294_v32 }
 0x22d   : > { %296 = vst [vmem:[%s156_s5] sm:$0xff] %v295_v33 }
 0x22e   : > { %499 = shalt.err (!%p496_p5)
}
 0x22f   : > { %s500_s24 = scalar_lea.hbm %s658_s15, 128  ;;  %s504_s27 = scalar_lea.hbm %s707_s2, 256 }
 0x230   : > { %p501_p6 = scmp.ne.s32.totalorder %s658_s15, %s500_s24  ;;  %p505_p10 = scmp.lt.u32.totalorder %s658_s15, %s707_s2 }
 0x231   : > { %p506_p11 = scmp.lt.u32.totalorder %s504_s27, %s500_s24  ;;  %p508_p13 = scmp.lt.u32.totalorder %s500_s24, %s658_s15 }
 0x232   : > { %p502_p7 = pnand %p501_p6, %p626_p4 }
 0x233   : > { %p507_p12 = por %p506_p11, %p505_p10 }
 0x234   : > { %p503_p9 = pneg %p502_p7 }
 0x235   : > { %p509_p0 = por %p508_p13, %p507_p12 }
 0x237   : > { %p510_p1 = pnand %p509_p0, %p503_p9 }
 0x239   : > { %513 = shalt.err (!%p510_p1)
}
 0x23a   : > { %423 = dma.vmem_to_hbm [thread:$0]  (%p626_p4), %s660_s6, 128, %s658_s15, %s298_s16  }
 0x23b PF: > { %p429_p2 = scmp.ge.s32.totalorder %s564_s14, 2  ;;  %s323_s30 = sand.u32 1, %s544_s9  }
 0x23c   : > { %s324_s3 = scalar_lea.sflag [#allocation5], %s323_s30 }
 0x23d   : > { %p426_p3 = pnand %p429_p2, %p633_p8 }
 0x23f   : > { %539 = dma.done.wait (!%p426_p3), %s324_s3, 128  }
 0x240   : > { %541 = vsyncadd (!%p426_p3), %s324_s3, 4294967168  ;;  %s15_s14 = sadd.s32 1, %s564_s14   ;;  %s710_s9 = smov %s548_s10 }
 0x241   : > { %p12_p5 = scmp.ge.s32.totalorder %s15_s14, 4   ;;  %s711_s10 = smov %s552_s11 }
 0x242   : > { %s712_s11 = smov %s639_s22  ;;  %s713_s12 = smov %s560_s13 }
 0x243   : > { %s714_s13 = smov %s716_s17  ;;  %14 = sbr.rel (!%p12_p5) target bundleno = 4 (0x4), region = 71 }
 0x24a   :  { %329 = vsyncpa [#allocation5], 1 }
 0x24b   :  { %331 = vsyncpa [#allocation5 + $0x1], 1 }

</bundles_post_ra>
